<compile_context>
chip_gen: v7x
topology: tpu7x:2x2x1
jax: 0.10.0
libtpu: 0.0.40
codegen_flags: <defaults>
</compile_context>

<pallas_src>
import functools

import jax
import jax.numpy as jnp
from jax.experimental import pallas as pl
from jax.experimental.pallas import tpu as pltpu

LANE = 128
SUB = 8
_VPU_K_MAX = 8  # first-layer contractions smaller than this run on the VPU


def _round_up(a, m):
    return (a + m - 1) // m * m


def _device_kind():
    try:
        return jax.devices()[0].device_kind.lower()
    except Exception:
        return ""


def _is_v7():
    kind = _device_kind()
    return ("v7" in kind) or ("7x" in kind)


# ---------------------------------------------------------------------------
# Kernel
# ---------------------------------------------------------------------------
def _mlp_kernel(x_ref, *refs, n_out, n_sub, vpu_k_max):
    """Fused MLP: tanh after every layer except the last.

    refs = (w0, b0, w1, b1, ..., wL, bL, out_ref).
    - MXU operands use the weights' dtype (bf16 by default); accumulation and all
      elementwise math (bias add, tanh) stay f32.
    - The batch tile is split into `n_sub` independent sub-tiles so the scheduler
      can overlap one chain's tanh (EUP) with the other's matmul (MXU).
    - Layer 0 with a tiny contraction runs on the VPU as broadcast FMAs.
    - Only the real n_out columns are written (masked narrow store).
    """
    out_ref = refs[-1]
    params = refs[:-1]
    n_layers = len(params) // 2
    tile = x_ref.shape[0]
    sub = tile // n_sub

    hs = [x_ref[pl.ds(s * sub, sub), :].astype(jnp.float32) for s in range(n_sub)]

    for li in range(n_layers):
        w = params[2 * li][...]
        b = params[2 * li + 1][...].astype(jnp.float32)
        d_in = w.shape[0]
        last = li == n_layers - 1
        use_vpu = (li == 0) and (d_in < vpu_k_max)
        w_f32 = w.astype(jnp.float32) if use_vpu else None

        ys = []
        for s in range(n_sub):
            h = hs[s]
            if use_vpu:
                # VPU path: tiny K -> broadcast multiply-adds, no MXU push/drain.
                acc = h[:, 0:1] * w_f32[0:1, :]
                for k in range(1, d_in):
                    acc = acc + h[:, k:k + 1] * w_f32[k:k + 1, :]
                y = acc + b
            else:
                y = jnp.dot(h.astype(w.dtype), w,
                            preferred_element_type=jnp.float32) + b
            ys.append(y)
        hs = ys if last else [jnp.tanh(y) for y in ys]

    for s in range(n_sub):
        out_ref[pl.ds(s * sub, sub), :] = hs[s][:, :n_out].astype(out_ref.dtype)


# ---------------------------------------------------------------------------
# One-time parameter preparation (hoisted out of the forward call)
# ---------------------------------------------------------------------------
def prepare_params(params, mxu_dtype=jnp.bfloat16):
    """Pad hidden/output feature dims to 128 lanes and cast weights to the MXU
    operand dtype. Semantics preserved: padded weight rows/cols are 0, padded bias
    is 0, tanh(0)=0. Call ONCE and reuse across forward calls.

    params: list of (W, b), W shape (in_features, out_features), b (1, out_features).
    """
    flat = []
    prev_out_p = None
    for li, (w, b) in enumerate(params):
        d_in, d_out = w.shape
        d_in_p = d_in if li == 0 else prev_out_p
        d_out_p = _round_up(d_out, LANE)
        # Layer 0 with a tiny contraction runs on the VPU in f32; everything else
        # feeds the MXU in mxu_dtype (accumulation is always f32 in-kernel).
        w_dtype = jnp.float32 if (li == 0 and d_in < _VPU_K_MAX) else mxu_dtype
        w_p = jnp.zeros((d_in_p, d_out_p), w_dtype).at[:d_in, :d_out].set(
            w.astype(w_dtype))
        b_p = jnp.zeros((1, d_out_p), jnp.float32).at[:, :d_out].set(
            b.reshape(1, -1).astype(jnp.float32))
        flat.extend([w_p, b_p])
        prev_out_p = d_out_p
    return dict(
        flat=tuple(flat),
        n_in=int(params[0][0].shape[0]),
        n_out=int(params[-1][0].shape[1]),
        hid_p=int(flat[0].shape[1]),
    )


def _vmem_bytes_needed(flat, tile, n_in, n_out, hid_p):
    """Exact-ish VMEM budget: params at their (8,128)/(16,128) tile-padded sizes,
    double-buffered x/out tiles, plus live f32 activation intermediates."""
    def padded_bytes(a):
        r, c = a.shape
        itemsize = a.dtype.itemsize
        sub_t = 8 * (4 // itemsize)          # f32: 8 sublanes, bf16: 16
        return _round_up(r, sub_t) * _round_up(c, LANE) * itemsize

    param_bytes = sum(padded_bytes(a) for a in flat)
    io_bytes = (2 * tile * _round_up(n_in, LANE) * 4
                + 2 * tile * _round_up(n_out, LANE) * 4)
    act_bytes = 6 * tile * hid_p * 4
    return param_bytes + io_bytes + act_bytes


# ---------------------------------------------------------------------------
# Forward wrapper
# ---------------------------------------------------------------------------
def fully_connected_forward(x, prepared, *, tile_batch=None, min_grid=None):
    """x: (B, n_in). prepared: output of prepare_params(). Returns (B, n_out)."""
    B, n_in = x.shape
    assert n_in == prepared["n_in"], "input width mismatch vs prepared params"
    n_out = prepared["n_out"]
    flat = prepared["flat"]

    if min_grid is None:
        # v7x has 2 TensorCores: a 'parallel' grid axis only helps if grid >= 2.
        min_grid = 2 if _is_v7() else 1

    # Tile choice: as big as possible (fewer fixed-cost grid steps, more rows per
    # MXU weight load), capped at 1024 rows; multiple of 16 so the kernel can run
    # two independent sub-tiles for MXU/EUP overlap.
    MAX_TILE = 1024
    if tile_batch is None:
        target = pl.cdiv(_round_up(B, SUB), max(min_grid, 1))
        tile_batch = min(_round_up(target, 2 * SUB), MAX_TILE)
    tile_batch = max(_round_up(int(tile_batch), SUB), SUB)
    n_sub = 2 if (tile_batch >= 16 and tile_batch % 16 == 0) else 1

    grid = pl.cdiv(B, tile_batch)
    B_pad = grid * tile_batch
    x_p = x if B_pad == B else jnp.pad(x, ((0, B_pad - B), (0, 0)))

    # Weights/biases are grid-invariant -> whole-array VMEM refs (no pipelining).
    wspec = pl.BlockSpec(memory_space=pltpu.MemorySpace.VMEM)
    in_specs = [pl.BlockSpec((tile_batch, n_in), lambda i: (i, 0))]
    in_specs += [wspec] * len(flat)

    # Output keeps only the real n_out columns (block last dim == full array dim,
    # so the non-128 width is legal): masked narrow stores, ~n_out/128 of the
    # HBM writeback of a lane-padded output slab.
    out_spec = pl.BlockSpec((tile_batch, n_out), lambda i: (i, 0))

    need = _vmem_bytes_needed(flat, tile_batch, n_in, n_out, prepared["hid_p"])
    cap = (32 << 20) if _is_v7() else (48 << 20)
    vmem_limit = int(min(max(int(1.25 * need) + (2 << 20), 8 << 20), cap))

    kernel = functools.partial(
        _mlp_kernel, n_out=n_out, n_sub=n_sub, vpu_k_max=_VPU_K_MAX)

    out = pl.pallas_call(
        kernel,
        out_shape=jax.ShapeDtypeStruct((B_pad, n_out), x.dtype),
        grid_spec=pltpu.PrefetchScalarGridSpec(
            num_scalar_prefetch=0,
            grid=(grid,),
            in_specs=in_specs,
            out_specs=out_spec,
        ),
        compiler_params=pltpu.CompilerParams(
            dimension_semantics=("parallel",),
            vmem_limit_bytes=vmem_limit,
        ),
    )(x_p, *flat)

    return out if B_pad == B else out[:B]


# ---------------------------------------------------------------------------
# Reference + init (PyTorch nn.Linear default init; W stored as (in, out))
# ---------------------------------------------------------------------------
def init_params(key, n_input, n_output, n_hidden, n_layers):
    dims = [n_input] + [n_hidden] * n_layers + [n_output]
    params = []
    for d_in, d_out in zip(dims[:-1], dims[1:]):
        key, kw, kb = jax.random.split(key, 3)
        bound = 1.0 / (d_in ** 0.5)
        w = jax.random.uniform(kw, (d_in, d_out), jnp.float32, -bound, bound)
        b = jax.random.uniform(kb, (1, d_out), jnp.float32, -bound, bound)
        params.append((w, b))
    return params


def reference_forward(x, params):
    h = x
    for li, (w, b) in enumerate(params):
        h = h @ w + b
        if li < len(params) - 1:
            h = jnp.tanh(h)
    return h


if __name__ == "__main__":
    N_INPUT, N_OUTPUT, N_HIDDEN, N_LAYERS = 2, 1, 32, 3
    BATCH = 100  # deliberately not a tile multiple -> exercises the padding path

    key = jax.random.PRNGKey(0)
    k_x, k_p = jax.random.split(key)
    x = jax.random.normal(k_x, (BATCH, N_INPUT), jnp.float32)
    params = init_params(k_p, N_INPUT, N_OUTPUT, N_HIDDEN, N_LAYERS)
    ref = reference_forward(x, params)

    # f32-operand MXU path: near-exact vs reference.
    prep_f32 = prepare_params(params, mxu_dtype=jnp.float32)
    out_f32 = jax.block_until_ready(fully_connected_forward(x, prep_f32))
    assert out_f32.shape == (BATCH, N_OUTPUT)
    assert jnp.allclose(out_f32, ref, atol=1e-5, rtol=1e-5), "f32 path mismatch"

    # Default path: bf16 MXU operands, f32 accumulation + f32 bias/tanh.
    # (PINN note: verify bf16 operand rounding is acceptable for residual/grad
    # accuracy; switch to mxu_dtype=jnp.float32 in prepare_params if not.)
    prep = prepare_params(params)
    out_bf16 = jax.block_until_ready(fully_connected_forward(x, prep))
    assert out_bf16.shape == (BATCH, N_OUTPUT)
    assert jnp.allclose(out_bf16, ref, atol=5e-2, rtol=5e-2), "bf16 path mismatch"

    # Forced multi-tile grid (the v7x two-TensorCore path) on any chip generation.
    out_g2 = jax.block_until_ready(
        fully_connected_forward(x, prep_f32, min_grid=2))
    assert jnp.allclose(out_g2, ref, atol=1e-5, rtol=1e-5), "multi-tile path mismatch"

    print("KERNEL_OK")
</pallas_src>

<mosaic_0001>
module attributes {stable_mosaic.version = 11 : i64} {
  func.func @_mlp_kernel(%arg0: i32, %arg1: memref<112x2xf32, #tpu.memory_space<vmem>>, %arg2: memref<2x128xf32, #tpu.memory_space<vmem>>, %arg3: memref<1x128xf32, #tpu.memory_space<vmem>>, %arg4: memref<128x128xf32, #tpu.memory_space<vmem>>, %arg5: memref<1x128xf32, #tpu.memory_space<vmem>>, %arg6: memref<128x128xf32, #tpu.memory_space<vmem>>, %arg7: memref<1x128xf32, #tpu.memory_space<vmem>>, %arg8: memref<128x128xf32, #tpu.memory_space<vmem>>, %arg9: memref<1x128xf32, #tpu.memory_space<vmem>>, %arg10: memref<112x1xf32, #tpu.memory_space<vmem>>) attributes {dimension_semantics = [#tpu.dimension_semantics<parallel>], iteration_bounds = array<i64: 1>, scalar_prefetch = 0 : i64, scratch_operands = 0 : i64, tpu.core_type = #tpu.core_type<tc>, window_params = [{transform_indices = @transform_0, window_bounds = array<i64: 112, 2>}, {pipeline_mode = #tpu.pipeline_mode<synchronous>, transform_indices = @transform_1, window_bounds = array<i64: 2, 128>}, {pipeline_mode = #tpu.pipeline_mode<synchronous>, transform_indices = @transform_2, window_bounds = array<i64: 1, 128>}, {pipeline_mode = #tpu.pipeline_mode<synchronous>, transform_indices = @transform_3, window_bounds = array<i64: 128, 128>}, {pipeline_mode = #tpu.pipeline_mode<synchronous>, transform_indices = @transform_4, window_bounds = array<i64: 1, 128>}, {pipeline_mode = #tpu.pipeline_mode<synchronous>, transform_indices = @transform_5, window_bounds = array<i64: 128, 128>}, {pipeline_mode = #tpu.pipeline_mode<synchronous>, transform_indices = @transform_6, window_bounds = array<i64: 1, 128>}, {pipeline_mode = #tpu.pipeline_mode<synchronous>, transform_indices = @transform_7, window_bounds = array<i64: 128, 128>}, {pipeline_mode = #tpu.pipeline_mode<synchronous>, transform_indices = @transform_8, window_bounds = array<i64: 1, 128>}, {transform_indices = @transform_9, window_bounds = array<i64: 112, 1>}]} {
    %c0 = arith.constant 0 : index
    %c0_0 = arith.constant 0 : index
    %0 = vector.load %arg1[%c0, %c0_0] : memref<112x2xf32, #tpu.memory_space<vmem>>, vector<56x2xf32>
    %c56 = arith.constant 56 : index
    %c0_1 = arith.constant 0 : index
    %1 = vector.load %arg1[%c56, %c0_1] : memref<112x2xf32, #tpu.memory_space<vmem>>, vector<56x2xf32>
    %c0_2 = arith.constant 0 : index
    %c0_3 = arith.constant 0 : index
    %2 = vector.load %arg2[%c0_2, %c0_3] : memref<2x128xf32, #tpu.memory_space<vmem>>, vector<2x128xf32>
    %c0_4 = arith.constant 0 : index
    %c0_5 = arith.constant 0 : index
    %3 = vector.load %arg3[%c0_4, %c0_5] : memref<1x128xf32, #tpu.memory_space<vmem>>, vector<1x128xf32>
    %4 = vector.extract_strided_slice %0 {offsets = [0, 0], sizes = [56, 1], strides = [1, 1]} : vector<56x2xf32> to vector<56x1xf32>
    %5 = vector.extract_strided_slice %2 {offsets = [0, 0], sizes = [1, 128], strides = [1, 1]} : vector<2x128xf32> to vector<1x128xf32>
    %6 = vector.broadcast %4 : vector<56x1xf32> to vector<56x128xf32>
    %7 = vector.broadcast %5 : vector<1x128xf32> to vector<56x128xf32>
    %8 = arith.mulf %6, %7 : vector<56x128xf32>
    %9 = vector.extract_strided_slice %0 {offsets = [0, 1], sizes = [56, 1], strides = [1, 1]} : vector<56x2xf32> to vector<56x1xf32>
    %10 = vector.extract_strided_slice %2 {offsets = [1, 0], sizes = [1, 128], strides = [1, 1]} : vector<2x128xf32> to vector<1x128xf32>
    %11 = vector.broadcast %9 : vector<56x1xf32> to vector<56x128xf32>
    %12 = vector.broadcast %10 : vector<1x128xf32> to vector<56x128xf32>
    %13 = arith.mulf %11, %12 : vector<56x128xf32>
    %14 = arith.addf %8, %13 : vector<56x128xf32>
    %15 = vector.broadcast %3 : vector<1x128xf32> to vector<56x128xf32>
    %16 = arith.addf %14, %15 : vector<56x128xf32>
    %17 = vector.extract_strided_slice %1 {offsets = [0, 0], sizes = [56, 1], strides = [1, 1]} : vector<56x2xf32> to vector<56x1xf32>
    %18 = vector.extract_strided_slice %2 {offsets = [0, 0], sizes = [1, 128], strides = [1, 1]} : vector<2x128xf32> to vector<1x128xf32>
    %19 = vector.broadcast %17 : vector<56x1xf32> to vector<56x128xf32>
    %20 = vector.broadcast %18 : vector<1x128xf32> to vector<56x128xf32>
    %21 = arith.mulf %19, %20 : vector<56x128xf32>
    %22 = vector.extract_strided_slice %1 {offsets = [0, 1], sizes = [56, 1], strides = [1, 1]} : vector<56x2xf32> to vector<56x1xf32>
    %23 = vector.extract_strided_slice %2 {offsets = [1, 0], sizes = [1, 128], strides = [1, 1]} : vector<2x128xf32> to vector<1x128xf32>
    %24 = vector.broadcast %22 : vector<56x1xf32> to vector<56x128xf32>
    %25 = vector.broadcast %23 : vector<1x128xf32> to vector<56x128xf32>
    %26 = arith.mulf %24, %25 : vector<56x128xf32>
    %27 = arith.addf %21, %26 : vector<56x128xf32>
    %28 = vector.broadcast %3 : vector<1x128xf32> to vector<56x128xf32>
    %29 = arith.addf %27, %28 : vector<56x128xf32>
    %30 = math.tanh %16 : vector<56x128xf32>
    %31 = math.tanh %29 : vector<56x128xf32>
    %c0_6 = arith.constant 0 : index
    %c0_7 = arith.constant 0 : index
    %32 = vector.load %arg4[%c0_6, %c0_7] : memref<128x128xf32, #tpu.memory_space<vmem>>, vector<128x128xf32>
    %c0_8 = arith.constant 0 : index
    %c0_9 = arith.constant 0 : index
    %33 = vector.load %arg5[%c0_8, %c0_9] : memref<1x128xf32, #tpu.memory_space<vmem>>, vector<1x128xf32>
    %cst = arith.constant dense<0.000000e+00> : vector<56x128xf32>
    %34 = tpu.matmul %30, %32, %cst {dimension_numbers = #tpu.dot_dimension_numbers<[1], [0], [0], [1], [0, 0, 1, 1], [], []>} : vector<56x128xf32>, vector<128x128xf32>, vector<56x128xf32> -> vector<56x128xf32>
    %35 = vector.broadcast %33 : vector<1x128xf32> to vector<56x128xf32>
    %36 = arith.addf %34, %35 : vector<56x128xf32>
    %cst_10 = arith.constant dense<0.000000e+00> : vector<56x128xf32>
    %37 = tpu.matmul %31, %32, %cst_10 {dimension_numbers = #tpu.dot_dimension_numbers<[1], [0], [0], [1], [0, 0, 1, 1], [], []>} : vector<56x128xf32>, vector<128x128xf32>, vector<56x128xf32> -> vector<56x128xf32>
    %38 = vector.broadcast %33 : vector<1x128xf32> to vector<56x128xf32>
    %39 = arith.addf %37, %38 : vector<56x128xf32>
    %40 = math.tanh %36 : vector<56x128xf32>
    %41 = math.tanh %39 : vector<56x128xf32>
    %c0_11 = arith.constant 0 : index
    %c0_12 = arith.constant 0 : index
    %42 = vector.load %arg6[%c0_11, %c0_12] : memref<128x128xf32, #tpu.memory_space<vmem>>, vector<128x128xf32>
    %c0_13 = arith.constant 0 : index
    %c0_14 = arith.constant 0 : index
    %43 = vector.load %arg7[%c0_13, %c0_14] : memref<1x128xf32, #tpu.memory_space<vmem>>, vector<1x128xf32>
    %cst_15 = arith.constant dense<0.000000e+00> : vector<56x128xf32>
    %44 = tpu.matmul %40, %42, %cst_15 {dimension_numbers = #tpu.dot_dimension_numbers<[1], [0], [0], [1], [0, 0, 1, 1], [], []>} : vector<56x128xf32>, vector<128x128xf32>, vector<56x128xf32> -> vector<56x128xf32>
    %45 = vector.broadcast %43 : vector<1x128xf32> to vector<56x128xf32>
    %46 = arith.addf %44, %45 : vector<56x128xf32>
    %cst_16 = arith.constant dense<0.000000e+00> : vector<56x128xf32>
    %47 = tpu.matmul %41, %42, %cst_16 {dimension_numbers = #tpu.dot_dimension_numbers<[1], [0], [0], [1], [0, 0, 1, 1], [], []>} : vector<56x128xf32>, vector<128x128xf32>, vector<56x128xf32> -> vector<56x128xf32>
    %48 = vector.broadcast %43 : vector<1x128xf32> to vector<56x128xf32>
    %49 = arith.addf %47, %48 : vector<56x128xf32>
    %50 = math.tanh %46 : vector<56x128xf32>
    %51 = math.tanh %49 : vector<56x128xf32>
    %c0_17 = arith.constant 0 : index
    %c0_18 = arith.constant 0 : index
    %52 = vector.load %arg8[%c0_17, %c0_18] : memref<128x128xf32, #tpu.memory_space<vmem>>, vector<128x128xf32>
    %c0_19 = arith.constant 0 : index
    %c0_20 = arith.constant 0 : index
    %53 = vector.load %arg9[%c0_19, %c0_20] : memref<1x128xf32, #tpu.memory_space<vmem>>, vector<1x128xf32>
    %cst_21 = arith.constant dense<0.000000e+00> : vector<56x128xf32>
    %54 = tpu.matmul %50, %52, %cst_21 {dimension_numbers = #tpu.dot_dimension_numbers<[1], [0], [0], [1], [0, 0, 1, 1], [], []>} : vector<56x128xf32>, vector<128x128xf32>, vector<56x128xf32> -> vector<56x128xf32>
    %55 = vector.broadcast %53 : vector<1x128xf32> to vector<56x128xf32>
    %56 = arith.addf %54, %55 : vector<56x128xf32>
    %cst_22 = arith.constant dense<0.000000e+00> : vector<56x128xf32>
    %57 = tpu.matmul %51, %52, %cst_22 {dimension_numbers = #tpu.dot_dimension_numbers<[1], [0], [0], [1], [0, 0, 1, 1], [], []>} : vector<56x128xf32>, vector<128x128xf32>, vector<56x128xf32> -> vector<56x128xf32>
    %58 = vector.broadcast %53 : vector<1x128xf32> to vector<56x128xf32>
    %59 = arith.addf %57, %58 : vector<56x128xf32>
    %60 = vector.extract_strided_slice %56 {offsets = [0, 0], sizes = [56, 1], strides = [1, 1]} : vector<56x128xf32> to vector<56x1xf32>
    %c0_23 = arith.constant 0 : index
    %c0_24 = arith.constant 0 : index
    %61 = vector.load %arg10[%c0_23, %c0_24] : memref<112x1xf32, #tpu.memory_space<vmem>>, vector<56x1xf32>
    tpu.vector_store %arg10[%c0_23, %c0_24], %60 {strides = array<i32>} : memref<112x1xf32, #tpu.memory_space<vmem>>, vector<56x1xf32>,
    %62 = vector.extract_strided_slice %59 {offsets = [0, 0], sizes = [56, 1], strides = [1, 1]} : vector<56x128xf32> to vector<56x1xf32>
    %c56_25 = arith.constant 56 : index
    %c0_26 = arith.constant 0 : index
    %63 = vector.load %arg10[%c56_25, %c0_26] : memref<112x1xf32, #tpu.memory_space<vmem>>, vector<56x1xf32>
    tpu.vector_store %arg10[%c56_25, %c0_26], %62 {strides = array<i32>} : memref<112x1xf32, #tpu.memory_space<vmem>>, vector<56x1xf32>,
    return
  }
  func.func @transform_0(%arg0: i32) -> (i32, i32) {
    %c0_i32 = arith.constant 0 : i32
    %c0_i32_0 = arith.constant 0 : i32
    return %arg0, %c0_i32 : i32, i32
  }
  func.func @transform_1(%arg0: i32) -> (i32, i32) {
    %c0_i32 = arith.constant 0 : i32
    %c0_i32_0 = arith.constant 0 : i32
    %c0_i32_1 = arith.constant 0 : i32
    return %c0_i32, %c0_i32_0 : i32, i32
  }
  func.func @transform_2(%arg0: i32) -> (i32, i32) {
    %c0_i32 = arith.constant 0 : i32
    %c0_i32_0 = arith.constant 0 : i32
    %c0_i32_1 = arith.constant 0 : i32
    return %c0_i32, %c0_i32_0 : i32, i32
  }
  func.func @transform_3(%arg0: i32) -> (i32, i32) {
    %c0_i32 = arith.constant 0 : i32
    %c0_i32_0 = arith.constant 0 : i32
    %c0_i32_1 = arith.constant 0 : i32
    return %c0_i32, %c0_i32_0 : i32, i32
  }
  func.func @transform_4(%arg0: i32) -> (i32, i32) {
    %c0_i32 = arith.constant 0 : i32
    %c0_i32_0 = arith.constant 0 : i32
    %c0_i32_1 = arith.constant 0 : i32
    return %c0_i32, %c0_i32_0 : i32, i32
  }
  func.func @transform_5(%arg0: i32) -> (i32, i32) {
    %c0_i32 = arith.constant 0 : i32
    %c0_i32_0 = arith.constant 0 : i32
    %c0_i32_1 = arith.constant 0 : i32
    return %c0_i32, %c0_i32_0 : i32, i32
  }
  func.func @transform_6(%arg0: i32) -> (i32, i32) {
    %c0_i32 = arith.constant 0 : i32
    %c0_i32_0 = arith.constant 0 : i32
    %c0_i32_1 = arith.constant 0 : i32
    return %c0_i32, %c0_i32_0 : i32, i32
  }
  func.func @transform_7(%arg0: i32) -> (i32, i32) {
    %c0_i32 = arith.constant 0 : i32
    %c0_i32_0 = arith.constant 0 : i32
    %c0_i32_1 = arith.constant 0 : i32
    return %c0_i32, %c0_i32_0 : i32, i32
  }
  func.func @transform_8(%arg0: i32) -> (i32, i32) {
    %c0_i32 = arith.constant 0 : i32
    %c0_i32_0 = arith.constant 0 : i32
    %c0_i32_1 = arith.constant 0 : i32
    return %c0_i32, %c0_i32_0 : i32, i32
  }
  func.func @transform_9(%arg0: i32) -> (i32, i32) {
    %c0_i32 = arith.constant 0 : i32
    %c0_i32_0 = arith.constant 0 : i32
    return %arg0, %c0_i32 : i32, i32
  }
}

</mosaic_0001>

<bundles_post_ra>
// kernel: tpu_custom_call.1
= control target key start
LH: loop header
LB: loop body
LE: loop exit
PB: predicated region body
PF: predicated region fallthrough
CT: control target
= control target key end

     0   :  { %14 = vsyncpa [#allocation3], 0  ;;  %s2210_s0 = inlined_call_operand.vmem [shape: f32[112,2], index: 0, kind: input, shape index: {}]   ;;  %s2211_s1 = inlined_call_operand.vmem [shape: f32[2,128], index: 1, kind: input, shape index: {}]   ;;  %s2212_s2 = inlined_call_operand.vmem [shape: f32[1,128], index: 2, kind: input, shape index: {}]   ;;  %s2213_s3 = inlined_call_operand.hbm [shape: f32[128,128], index: 3, kind: input, shape index: {}]   ;;  %s2214_s4 = inlined_call_operand.vmem [shape: f32[1,128], index: 4, kind: input, shape index: {}]   ;;  %s2215_s5 = inlined_call_operand.vmem [shape: f32[128,128], index: 5, kind: input, shape index: {}]   ;;  %s2216_s6 = inlined_call_operand.vmem [shape: f32[1,128], index: 6, kind: input, shape index: {}]   ;;  %s2217_s7 = inlined_call_operand.hbm [shape: f32[128,128], index: 7, kind: input, shape index: {}]   ;;  %s2218_s8 = inlined_call_operand.vmem [shape: f32[1,128], index: 8, kind: input, shape index: {}]   ;;  %s2219_s9 = inlined_call_operand.vmem [shape: f32[112,1], index: 9, kind: output, shape index: {}]  }
   0x1   :  { %15 = vsyncpa [#allocation5], 0  ;;  %s1754_s30 = smov [#allocation2]   ;;  %s1706_s13 = scalar_lea.hbm %s2213_s3, 2048 }
   0x2   :  { %s27_s10 = sshll.u32 %s1754_s30, 4  ;;  %p1707_p0 = scmp.ne.s32.totalorder %s2213_s3, %s1706_s13  ;;  %s28_s10 = int_to_ptr.vmem [resolvable:$true] %s27_s10 }
   0x3   :  { %p1710_p1 = scmp.lt.u32.totalorder %s1706_s13, %s2213_s3 }
   0x5   :  { %p1712_p2 = pnand %p1710_p1, %p1707_p0 }
   0x7   :  { %1715 = shalt.err (!%p1712_p2)
}
   0x8   :  { %s1716_s18 = scalar_lea.vmem %s28_s10, 2048  ;;  %p1721_p4 = scmp.lt.s32.totalorder %s28_s10, %s28_s10 }
   0x9   :  { %p1717_p3 = scmp.ne.s32.totalorder %s28_s10, %s1716_s18  ;;  %p1722_p5 = scmp.lt.s32.totalorder %s1716_s18, %s1716_s18 }
   0xb   :  { %p1723_p6 = por %p1722_p5, %p1721_p4 }
   0xd   :  { %p1724_p7 = pnand %p1723_p6, %p1717_p3 }
   0xf   :  { %1727 = shalt.err (!%p1724_p7)
}
  0x10   :  { %s1755_s19 = smov 128   ;;  %s1756_s20 = smov 8  }
  0x11   :  { %33 = dma.hbm_to_vmem [thread:$0]  %s2213_s3, 2048, %s28_s10, [#allocation3], %s1755_s19, %s1755_s19, %s1756_s20  }
  0x12   :  { %s1757_s23 = smov [#allocation4]   ;;  %s1728_s27 = scalar_lea.hbm %s2217_s7, 2048 }
  0x13   :  { %s45_s24 = sshll.u32 %s1757_s23, 4  ;;  %p1729_p8 = scmp.ne.s32.totalorder %s2217_s7, %s1728_s27  ;;  %s46_s24 = int_to_ptr.vmem [resolvable:$true] %s45_s24 }
  0x14   :  { %p1732_p9 = scmp.lt.u32.totalorder %s1728_s27, %s2217_s7 }
  0x16   :  { %p1734_p10 = pnand %p1732_p9, %p1729_p8 }
  0x18   :  { %1737 = shalt.err (!%p1734_p10)
}
  0x19   :  { %s1738_s12 = scalar_lea.vmem %s46_s24, 2048  ;;  %p1743_p12 = scmp.lt.s32.totalorder %s46_s24, %s46_s24 }
  0x1a   :  { %p1739_p11 = scmp.ne.s32.totalorder %s46_s24, %s1738_s12  ;;  %p1744_p13 = scmp.lt.s32.totalorder %s1738_s12, %s1738_s12 }
  0x1c   :  { %p1745_p0 = por %p1744_p13, %p1743_p12 }
  0x1e   :  { %p1746_p1 = pnand %p1745_p0, %p1739_p11 }
  0x20   :  { %1749 = shalt.err (!%p1746_p1)
}
  0x21   :  { %51 = dma.hbm_to_vmem [thread:$0]  %s2217_s7, 2048, %s46_s24, [#allocation5], %s1755_s19, %s1755_s19, %s1756_s20  }
  0x22   :  { %1750 = dma.done.wait [#allocation3], 2048  }
  0x23   :  { %1751 = vsyncadd [#allocation3], 4294965248 }
  0x24   :  { %1752 = dma.done.wait [#allocation5], 2048  }
  0x25   :  { %1753 = vsyncadd [#allocation5], 4294965248  ;;  %v1758_v0 = vmov 0   ;;  %v1759_v1 = vmov 0.0|0.0   ;;  %v67_v2 = vld [vmem:[%s2210_s0 + $0x38] sm:$0xff]  ;;  %v60_v3 = vld [vmem:[%s2210_s0] sm:$0xff]  ;;  %v111_v42 = vlaneseq }
  0x26   :  { %1619 = vset.pattern.permute.xlu1 %v1758_v0  ;;  %1617 = vset.pattern.permute.xlu0 %v1758_v0  ;;  %v286_v4 = vld [vmem:[#allocation2] sm:$0xff]  ;;  %v1760_v5 = vmov 1   ;;  %v287_v6 = vld [vmem:[#allocation2 + $0x8] sm:$0xff]  ;;  %v288_v7 = vld [vmem:[#allocation2 + $0x10] sm:$0xff]  ;;  %vm1761_vm0 = vmmov 0   ;;  %v1762_v27 = vmov 0.0  }
  0x27   :  { %1464 = vmatprep.subr.bf16.mxu0 %v1759_v1  ;;  %1488 = vmatprep.subr.bf16.mxu1 %v1759_v1  ;;  %v289_v8 = vld [vmem:[#allocation2 + $0x18] sm:$0xff]  ;;  %v1465_v9 = vpack.c.bf16 %v287_v6, %v286_v4  ;;  %v61_v10 = vld [vmem:[%s2210_s0 + $0x8] sm:$0xff]  ;;  %v290_v12 = vld [vmem:[#allocation2 + $0x20] sm:$0xff]  ;;  %v112_v43 = vshrl.u32 %v111_v42, 7  ;;  %vm983_vm1 = vcmask 7168  }
  0x28   :  { %183 = vperm.xlu1 %1619, %v67_v2   ;;  %78 = vperm.xlu0 %1617, %v60_v3   ;;  %v1468_v11 = vpack.c.bf16 %v289_v8, %v288_v7  ;;  %v291_v13 = vld [vmem:[#allocation2 + $0x28] sm:$0xff]  ;;  %v68_v14 = vld [vmem:[%s2210_s0 + $0x40] sm:$0xff]  ;;  %v292_v16 = vld [vmem:[#allocation2 + $0x30] sm:$0xff] }
  0x29   :  { %1466 = vmatpush3.bf16.msra.mxu0 %v1465_v9  ;;  %1490 = vmatpush3.bf16.msra.mxu1 %v1465_v9  ;;  %v1471_v15 = vpack.c.bf16 %v291_v13, %v290_v12  ;;  %v293_v17 = vld [vmem:[#allocation2 + $0x38] sm:$0xff]  ;;  %v62_v18 = vld [vmem:[%s2210_s0 + $0x10] sm:$0xff]  ;;  %v294_v20 = vld [vmem:[#allocation2 + $0x40] sm:$0xff]  ;;  %v113_v44 = vsub.s32 0, %v112_v43  ;;  %v152_v45 = vsub.s32 1, %v112_v43 }
  0x2a   :  { %1467 = vmatprep.subr.bf16.mxu0 %v1759_v1  ;;  %1491 = vmatprep.subr.bf16.mxu1 %v1759_v1  ;;  %v1474_v19 = vpack.c.bf16 %v293_v17, %v292_v16  ;;  %v295_v21 = vld [vmem:[#allocation2 + $0x48] sm:$0xff]  ;;  %v296_v24 = vld [vmem:[#allocation2 + $0x50] sm:$0xff]  ;;  %v297_v25 = vld [vmem:[#allocation2 + $0x58] sm:$0xff] }
  0x2b   :  { %v69_v22 = vld [vmem:[%s2210_s0 + $0x48] sm:$0xff]  ;;  %v1477_v23 = vpack.c.bf16 %v295_v21, %v294_v20  ;;  %v63_v26 = vld [vmem:[%s2210_s0 + $0x18] sm:$0xff]  ;;  %1178 = vmatprep.mubr.msk.f32.mxu0 %vm1761_vm0, %v1762_v27  ;;  %v1480_v28 = vpack.c.bf16 %v297_v25, %v296_v24  ;;  %v298_v29 = vld [vmem:[#allocation2 + $0x60] sm:$0xff]  ;;  %1231 = vmatprep.mubr.msk.f32.mxu1 %vm1761_vm0, %v1762_v27 }
  0x2c   :  { %1620 = vset.pattern.permute.xlu1 %v1760_v5  ;;  %1618 = vset.pattern.permute.xlu0 %v1760_v5  ;;  %v299_v30 = vld [vmem:[#allocation2 + $0x68] sm:$0xff]  ;;  %v70_v31 = vld [vmem:[%s2210_s0 + $0x50] sm:$0xff]  ;;  %v301_v34 = vld [vmem:[#allocation2 + $0x78] sm:$0xff] }
  0x2d   :  { %224 = vperm.xlu1 %1620, %v67_v2   ;;  %123 = vperm.xlu0 %1618, %v60_v3   ;;  %v1483_v32 = vpack.c.bf16 %v299_v30, %v298_v29  ;;  %v300_v33 = vld [vmem:[#allocation2 + $0x70] sm:$0xff]  ;;  %v64_v35 = vld [vmem:[%s2210_s0 + $0x20] sm:$0xff]  ;;  %v71_v37 = vld [vmem:[%s2210_s0 + $0x58] sm:$0xff] }
  0x2e   :  { %1469 = vmatpush3.bf16.msra.mxu0 %v1468_v11  ;;  %1493 = vmatpush3.bf16.msra.mxu1 %v1468_v11  ;;  %v1486_v36 = vpack.c.bf16 %v301_v34, %v300_v33  ;;  %v65_v38 = vld [vmem:[%s2210_s0 + $0x28] sm:$0xff]  ;;  %v72_v39 = vld [vmem:[%s2210_s0 + $0x60] sm:$0xff]  ;;  %v66_v40 = vld [vmem:[%s2210_s0 + $0x30] sm:$0xff] }
  0x2f   :  { %1470 = vmatprep.subr.bf16.mxu0 %v1759_v1  ;;  %1494 = vmatprep.subr.bf16.mxu1 %v1759_v1  ;;  %v73_v41 = vld [vmem:[%s2210_s0 + $0x68] sm:$0xff]  ;;  %v74_v46 = vld [vmem:[%s2211_s1] sm:$0x3]  ;;  %v526_v24 = vld [vmem:[%s2215_s5 + $0x18] sm:$0xff] }
  0x30   :  { %v1904_v49 = vrot.slane %v74_v46, %v113_v44  ;;  %v1906_v50 = vrot.slane %v74_v46, %v152_v45  ;;  %v1915_v57 = vld [vmem:[%s2212_s2] ss:$0 sm:$0xff]  ;;  %v529_v44 = vld [vmem:[%s2215_s5 + $0x30] sm:$0xff]  ;;  %v530_v45 = vld [vmem:[%s2215_s5 + $0x38] sm:$0xff] }
  0x31   :  { %1621 = vset.pattern.permute.xlu1 %v1758_v0  ;;  %127 = vperm.xlu0 %1618, %v61_v10   ;;  %v523_v13 = vld [vmem:[%s2215_s5] sm:$0xff] }
  0x32   :  { %83 = vperm.xlu1 %1621, %v61_v10   ;;  %1472 = vmatpush3.bf16.msra.mxu0 %v1471_v15  ;;  %v527_v34 = vld [vmem:[%s2215_s5 + $0x20] sm:$0xff] }
  0x33   :  { %1496 = vmatpush3.bf16.msra.mxu1 %v1471_v15  ;;  %1473 = vmatprep.subr.bf16.mxu0 %v1759_v1 }
  0x34   :  { %1497 = vmatprep.subr.bf16.mxu1 %v1759_v1 }
  0x35   :  { %228 = vperm.xlu0 %1618, %v68_v14  }
  0x36   :  { %188 = vperm.xlu1 %1621, %v68_v14   ;;  %1475 = vmatpush3.bf16.msra.mxu0 %v1474_v19  ;;  %v524_v14 = vld [vmem:[%s2215_s5 + $0x8] sm:$0xff] }
  0x37   :  { %1499 = vmatpush3.bf16.msra.mxu1 %v1474_v19  ;;  %1476 = vmatprep.subr.bf16.mxu0 %v1759_v1  ;;  %v1513_v19 = vpack.c.bf16 %v524_v14, %v523_v13 }
  0x38   :  { %1500 = vmatprep.subr.bf16.mxu1 %v1759_v1 }
  0x39   :  { %131 = vperm.xlu0 %1618, %v62_v18  }
  0x3a   :  { %88 = vperm.xlu1 %1621, %v62_v18   ;;  %1478 = vmatpush3.bf16.msra.mxu0 %v1477_v23 }
  0x3b   :  { %1502 = vmatpush3.bf16.msra.mxu1 %v1477_v23  ;;  %1479 = vmatprep.subr.bf16.mxu0 %v1759_v1  ;;  %v525_v23 = vld [vmem:[%s2215_s5 + $0x10] sm:$0xff] }
  0x3c   :  { %1503 = vmatprep.subr.bf16.mxu1 %v1759_v1 }
  0x3d   :  { %232 = vperm.xlu0 %1618, %v69_v22  }
  0x3e   :  { %193 = vperm.xlu1 %1621, %v69_v22   ;;  %1481 = vmatpush3.bf16.msra.mxu0 %v1480_v28 }
  0x3f   :  { %1505 = vmatpush3.bf16.msra.mxu1 %v1480_v28  ;;  %1482 = vmatprep.subr.bf16.mxu0 %v1759_v1 }
  0x40   :  { %1506 = vmatprep.subr.bf16.mxu1 %v1759_v1 }
  0x41   :  { %135 = vperm.xlu0 %1618, %v63_v26  }
  0x42   :  { %93 = vperm.xlu1 %1621, %v63_v26   ;;  %1484 = vmatpush3.bf16.msra.mxu0 %v1483_v32 }
  0x43   :  { %1508 = vmatpush3.bf16.msra.mxu1 %v1483_v32  ;;  %1485 = vmatprep.subr.bf16.mxu0 %v1759_v1 }
  0x44   :  { %1509 = vmatprep.subr.bf16.mxu1 %v1759_v1 }
  0x45   :  { %236 = vperm.xlu0 %1618, %v70_v31  }
  0x46   :  { %198 = vperm.xlu1 %1621, %v70_v31   ;;  %1487 = vmatpush3.bf16.msra.mxu0 %v1486_v36  ;;  %v1516_v31 = vpack.c.bf16 %v526_v24, %v525_v23 }
  0x47   :  { %1511 = vmatpush3.bf16.msra.mxu1 %v1486_v36  ;;  %1512 = vmatprep.subr.bf16.mxu0 %v1759_v1 }
  0x48   :  { %1536 = vmatprep.subr.bf16.mxu1 %v1759_v1 }
  0x49   :  { %139 = vperm.xlu0 %1618, %v64_v35  }
  0x4a   :  { %98 = vperm.xlu1 %1621, %v64_v35   ;;  %v528_v35 = vld [vmem:[%s2215_s5 + $0x28] sm:$0xff] }
  0x4d   :  { %240 = vperm.xlu0 %1618, %v71_v37  }
  0x4e   :  { %203 = vperm.xlu1 %1621, %v71_v37  }
  0x51   :  { %143 = vperm.xlu0 %1618, %v65_v38  }
  0x52   :  { %103 = vperm.xlu1 %1621, %v65_v38  }
  0x55   :  { %244 = vperm.xlu0 %1618, %v72_v39  }
  0x56   :  { %208 = vperm.xlu1 %1621, %v72_v39  }
  0x59   :  { %147 = vperm.xlu0 %1618, %v66_v40  }
  0x5a   :  { %108 = vperm.xlu1 %1621, %v66_v40  }
  0x5d   :  { %248 = vperm.xlu0 %1618, %v73_v41  }
  0x5e   :  { %213 = vperm.xlu1 %1621, %v73_v41   ;;  %v1519_v41 = vpack.c.bf16 %v528_v35, %v527_v34 }
  0xa7   :  { %v184_v47 = vpop.permute.xlu1 %183  ;;  %v79_v48 = vpop.permute.xlu0 %78 }
  0xa8   :  { %v216_v53 = vmul.f32 %v184_v47, %v1904_v49  ;;  %v115_v54 = vmul.f32 %v1904_v49, %v79_v48 }
  0xac   :  { %v225_v51 = vpop.permute.xlu1 %224  ;;  %v124_v52 = vpop.permute.xlu0 %123 }
  0xad   :  { %v251_v55 = vmul.f32 %v225_v51, %v1906_v50  ;;  %v154_v56 = vmul.f32 %v1906_v50, %v124_v52 }
  0xaf   :  { %v258_v58 = vadd.f32 %v251_v55, %v216_v53  ;;  %v161_v59 = vadd.f32 %v154_v56, %v115_v54  ;;  %v1522_v53 = vpack.c.bf16 %v530_v45, %v529_v44  ;;  %v531_v56 = vld [vmem:[%s2215_s5 + $0x40] sm:$0xff]  ;;  %v537_v45 = vld [vmem:[%s2215_s5 + $0x70] sm:$0xff] }
  0xb0   :  { %v128_v60 = vpop.permute.xlu0 %127 }
  0xb1   :  { %v265_v61 = vadd.f32 %v1915_v57, %v258_v58  ;;  %v174_v62 = vadd.f32 %v1915_v57, %v161_v59  ;;  %v155_v63 = vmul.f32 %v1906_v50, %v128_v60  ;;  %v84_v0 = vpop.permute.xlu1 %83  ;;  %v532_v58 = vld [vmem:[%s2215_s5 + $0x48] sm:$0xff] }
  0xb2   :  { %v116_v2 = vmul.f32 %v1904_v49, %v84_v0  ;;  %v1525_v0 = vpack.c.bf16 %v532_v58, %v531_v56 }
  0xb3   :  { %1622 = vtanh.f32 %v265_v61 }
  0xb4   :  { %1624 = vtanh.f32 %v174_v62  ;;  %v162_v3 = vadd.f32 %v155_v63, %v116_v2  ;;  %v229_v4 = vpop.permute.xlu0 %228 }
  0xb5   :  { %v252_v5 = vmul.f32 %v229_v4, %v1906_v50  ;;  %v189_v6 = vpop.permute.xlu1 %188 }
  0xb6   :  { %v175_v7 = vadd.f32 %v1915_v57, %v162_v3  ;;  %v217_v8 = vmul.f32 %v189_v6, %v1904_v49 }
  0xb8   :  { %1626 = vtanh.f32 %v175_v7  ;;  %v259_v9 = vadd.f32 %v252_v5, %v217_v8  ;;  %v132_v10 = vpop.permute.xlu0 %131 }
  0xb9   :  { %v156_v11 = vmul.f32 %v1906_v50, %v132_v10  ;;  %v89_v12 = vpop.permute.xlu1 %88 }
  0xba   :  { %v266_v15 = vadd.f32 %v1915_v57, %v259_v9  ;;  %v117_v16 = vmul.f32 %v1904_v49, %v89_v12 }
  0xbc   :  { %1628 = vtanh.f32 %v266_v15  ;;  %v163_v17 = vadd.f32 %v156_v11, %v117_v16  ;;  %v233_v18 = vpop.permute.xlu0 %232 }
  0xbd   :  { %v1623_v20 = vpop.eup %1622  ;;  %v253_v21 = vmul.f32 %v233_v18, %v1906_v50  ;;  %v194_v22 = vpop.permute.xlu1 %193 }
  0xbe   :  { %v1625_v25 = vpop.eup %1624  ;;  %v176_v26 = vadd.f32 %v1915_v57, %v163_v17  ;;  %v218_v28 = vmul.f32 %v194_v22, %v1904_v49  ;;  %1232 = vmatmul.mubr.f32.vlgmr.msra.gmra.mrb[0].mxu1 %v1623_v20 }
  0xbf   :  { %1179 = vmatmul.mubr.f32.vlgmr.msra.gmra.mrb[0].mxu0 %v1625_v25  ;;  %1234 = vmatprep.mubr.msk.f32.mxu1 %vm1761_vm0, %v1762_v27 }
  0xc0   :  { %1630 = vtanh.f32 %v176_v26  ;;  %v260_v29 = vadd.f32 %v253_v21, %v218_v28  ;;  %v136_v30 = vpop.permute.xlu0 %135  ;;  %1181 = vmatprep.mubr.msk.f32.mxu0 %vm1761_vm0, %v1762_v27  ;;  %1514 = vmatpush3.bf16.msra.mxu0 %v1513_v19 }
  0xc1   :  { %v157_v32 = vmul.f32 %v1906_v50, %v136_v30  ;;  %v94_v33 = vpop.permute.xlu1 %93  ;;  %1538 = vmatpush3.bf16.msra.mxu1 %v1513_v19  ;;  %1515 = vmatprep.subr.bf16.mxu0 %v1759_v1 }
  0xc2   :  { %v1627_v36 = vpop.eup %1626  ;;  %v267_v37 = vadd.f32 %v1915_v57, %v260_v29  ;;  %v118_v38 = vmul.f32 %v1904_v49, %v94_v33  ;;  %1539 = vmatprep.subr.bf16.mxu1 %v1759_v1 }
  0xc3   :  { %1182 = vmatmul.mubr.f32.gmra.mrb[2].mxu0 %v1627_v36 }
  0xc4   :  { %1632 = vtanh.f32 %v267_v37  ;;  %v164_v39 = vadd.f32 %v157_v32, %v118_v38  ;;  %v237_v40 = vpop.permute.xlu0 %236  ;;  %1184 = vmatprep.mubr.msk.f32.mxu0 %vm1761_vm0, %v1762_v27  ;;  %1517 = vmatpush3.bf16.msra.mxu0 %v1516_v31 }
  0xc5   :  { %v254_v42 = vmul.f32 %v237_v40, %v1906_v50  ;;  %v199_v43 = vpop.permute.xlu1 %198  ;;  %1541 = vmatpush3.bf16.msra.mxu1 %v1516_v31  ;;  %1518 = vmatprep.subr.bf16.mxu0 %v1759_v1  ;;  %v534_v40 = vld [vmem:[%s2215_s5 + $0x58] sm:$0xff] }
  0xc6   :  { %v1629_v46 = vpop.eup %1628  ;;  %v177_v47 = vadd.f32 %v1915_v57, %v164_v39  ;;  %v219_v48 = vmul.f32 %v199_v43, %v1904_v49  ;;  %1542 = vmatprep.subr.bf16.mxu1 %v1759_v1  ;;  %v536_v43 = vld [vmem:[%s2215_s5 + $0x68] sm:$0xff] }
  0xc7   :  { %1235 = vmatmul.mubr.f32.gmra.mrb[2].mxu1 %v1629_v46  ;;  %v538_v46 = vld [vmem:[%s2215_s5 + $0x78] sm:$0xff] }
  0xc8   :  { %1634 = vtanh.f32 %v177_v47  ;;  %v261_v51 = vadd.f32 %v254_v42, %v219_v48  ;;  %v140_v52 = vpop.permute.xlu0 %139  ;;  %1237 = vmatprep.mubr.msk.f32.mxu1 %vm1761_vm0, %v1762_v27  ;;  %1520 = vmatpush3.bf16.msra.mxu0 %v1519_v41  ;;  %v535_v42 = vld [vmem:[%s2215_s5 + $0x60] sm:$0xff]  ;;  %v1534_v47 = vpack.c.bf16 %v538_v46, %v537_v45 }
  0xc9   :  { %v158_v54 = vmul.f32 %v1906_v50, %v140_v52  ;;  %v99_v55 = vpop.permute.xlu1 %98  ;;  %1544 = vmatpush3.bf16.msra.mxu1 %v1519_v41  ;;  %1521 = vmatprep.subr.bf16.mxu0 %v1759_v1  ;;  %v1531_v44 = vpack.c.bf16 %v536_v43, %v535_v42  ;;  %v2050_v48 = vld [vmem:[%s2214_s4] ss:$0 sm:$0xff] }
  0xca   :  { %v1631_v59 = vpop.eup %1630  ;;  %v268_v60 = vadd.f32 %v1915_v57, %v261_v51  ;;  %v119_v61 = vmul.f32 %v1904_v49, %v99_v55  ;;  %1545 = vmatprep.subr.bf16.mxu1 %v1759_v1 }
  0xcb   :  { %1185 = vmatmul.mubr.f32.gmra.mrb[4].mxu0 %v1631_v59 }
  0xcc   :  { %1636 = vtanh.f32 %v268_v60  ;;  %v165_v62 = vadd.f32 %v158_v54, %v119_v61  ;;  %v241_v63 = vpop.permute.xlu0 %240  ;;  %1187 = vmatprep.mubr.msk.f32.mxu0 %vm1761_vm0, %v1762_v27  ;;  %1523 = vmatpush3.bf16.msra.mxu0 %v1522_v53 }
  0xcd   :  { %v255_v2 = vmul.f32 %v241_v63, %v1906_v50  ;;  %v204_v3 = vpop.permute.xlu1 %203  ;;  %1547 = vmatpush3.bf16.msra.mxu1 %v1522_v53  ;;  %1524 = vmatprep.subr.bf16.mxu0 %v1759_v1  ;;  %v761_v63 = vld [vmem:[#allocation4 + $0x8] sm:$0xff] }
  0xce   :  { %v1633_v4 = vpop.eup %1632  ;;  %v178_v5 = vadd.f32 %v1915_v57, %v165_v62  ;;  %v220_v6 = vmul.f32 %v204_v3, %v1904_v49  ;;  %1548 = vmatprep.subr.bf16.mxu1 %v1759_v1  ;;  %v760_v62 = vld [vmem:[#allocation4] sm:$0xff] }
  0xcf   :  { %1238 = vmatmul.mubr.f32.gmra.mrb[4].mxu1 %v1633_v4  ;;  %v1561_v3 = vpack.c.bf16 %v761_v63, %v760_v62  ;;  %v771_v62 = vld [vmem:[#allocation4 + $0x58] sm:$0xff] }
  0xd0   :  { %1638 = vtanh.f32 %v178_v5  ;;  %v262_v7 = vadd.f32 %v255_v2, %v220_v6  ;;  %v144_v8 = vpop.permute.xlu0 %143  ;;  %1240 = vmatprep.mubr.msk.f32.mxu1 %vm1761_vm0, %v1762_v27  ;;  %1526 = vmatpush3.bf16.msra.mxu0 %v1525_v0  ;;  %v762_v6 = vld [vmem:[#allocation4 + $0x10] sm:$0xff] }
  0xd1   :  { %v159_v9 = vmul.f32 %v1906_v50, %v144_v8  ;;  %v104_v10 = vpop.permute.xlu1 %103  ;;  %1550 = vmatpush3.bf16.msra.mxu1 %v1525_v0  ;;  %1527 = vmatprep.subr.bf16.mxu0 %v1759_v1 }
  0xd2   :  { %v1635_v11 = vpop.eup %1634  ;;  %v269_v12 = vadd.f32 %v1915_v57, %v262_v7  ;;  %v120_v13 = vmul.f32 %v1904_v49, %v104_v10  ;;  %1551 = vmatprep.subr.bf16.mxu1 %v1759_v1  ;;  %v763_v7 = vld [vmem:[#allocation4 + $0x18] sm:$0xff] }
  0xd3   :  { %1188 = vmatmul.mubr.f32.gmra.mrb[6].mxu0 %v1635_v11  ;;  %v1564_v11 = vpack.c.bf16 %v763_v7, %v762_v6  ;;  %v2111_v7 = vld [vmem:[%s2216_s6] ss:$0 sm:$0xff] }
  0xd4   :  { %1640 = vtanh.f32 %v269_v12  ;;  %v166_v14 = vadd.f32 %v159_v9, %v120_v13  ;;  %v245_v15 = vpop.permute.xlu0 %244  ;;  %1190 = vmatprep.mubr.msk.f32.mxu0 %vm1761_vm0, %v1762_v27  ;;  %v764_v13 = vld [vmem:[#allocation4 + $0x20] sm:$0xff] }
  0xd5   :  { %v256_v16 = vmul.f32 %v245_v15, %v1906_v50  ;;  %v209_v17 = vpop.permute.xlu1 %208 }
  0xd6   :  { %v1637_v18 = vpop.eup %1636  ;;  %v179_v19 = vadd.f32 %v1915_v57, %v166_v14  ;;  %v221_v20 = vmul.f32 %v209_v17, %v1904_v49  ;;  %v765_v14 = vld [vmem:[#allocation4 + $0x28] sm:$0xff] }
  0xd7   :  { %1241 = vmatmul.mubr.f32.gmra.mrb[6].mxu1 %v1637_v18  ;;  %v1567_v18 = vpack.c.bf16 %v765_v14, %v764_v13 }
  0xd8   :  { %1642 = vtanh.f32 %v179_v19  ;;  %v263_v21 = vadd.f32 %v256_v16, %v221_v20  ;;  %v148_v22 = vpop.permute.xlu0 %147  ;;  %1243 = vmatprep.mubr.msk.f32.mxu1 %vm1761_vm0, %v1762_v27  ;;  %v766_v20 = vld [vmem:[#allocation4 + $0x30] sm:$0xff] }
  0xd9   :  { %v160_v23 = vmul.f32 %v1906_v50, %v148_v22  ;;  %v109_v24 = vpop.permute.xlu1 %108 }
  0xda   :  { %v1639_v25 = vpop.eup %1638  ;;  %v270_v26 = vadd.f32 %v1915_v57, %v263_v21  ;;  %v121_v28 = vmul.f32 %v1904_v49, %v109_v24  ;;  %v767_v21 = vld [vmem:[#allocation4 + $0x38] sm:$0xff] }
  0xdb   :  { %1191 = vmatmul.mubr.f32.gmra.mrb[8].mxu0 %v1639_v25  ;;  %v1570_v25 = vpack.c.bf16 %v767_v21, %v766_v20 }
  0xdc   :  { %1644 = vtanh.f32 %v270_v26  ;;  %v167_v29 = vadd.f32 %v160_v23, %v121_v28  ;;  %v249_v30 = vpop.permute.xlu0 %248  ;;  %1193 = vmatprep.mubr.msk.f32.mxu0 %vm1761_vm0, %v1762_v27  ;;  %v768_v28 = vld [vmem:[#allocation4 + $0x40] sm:$0xff] }
  0xdd   :  { %v257_v31 = vmul.f32 %v249_v30, %v1906_v50  ;;  %v214_v32 = vpop.permute.xlu1 %213 }
  0xde   :  { %v1641_v33 = vpop.eup %1640  ;;  %v180_v34 = vadd.f32 %v1915_v57, %v167_v29  ;;  %v222_v35 = vmul.f32 %v214_v32, %v1904_v49  ;;  %v769_v29 = vld [vmem:[#allocation4 + $0x48] sm:$0xff] }
  0xdf   :  { %1244 = vmatmul.mubr.f32.gmra.mrb[8].mxu1 %v1641_v33  ;;  %v1573_v33 = vpack.c.bf16 %v769_v29, %v768_v28 }
  0xe0   :  { %1646 = vtanh.f32 %v180_v34  ;;  %v264_v36 = vadd.f32 %v257_v31, %v222_v35  ;;  %1246 = vmatprep.mubr.msk.f32.mxu1 %vm1761_vm0, %v1762_v27 }
  0xe2   :  { %v1643_v37 = vpop.eup %1642  ;;  %v271_v38 = vadd.f32 %v1915_v57, %v264_v36  ;;  %v533_v57 = vld [vmem:[%s2215_s5 + $0x50] sm:$0xff] }
  0xe3   :  { %1194 = vmatmul.mubr.f32.gmra.mrb[10].mxu0 %v1643_v37  ;;  %v1528_v41 = vpack.c.bf16 %v534_v40, %v533_v57 }
  0xe4   :  { %1648 = vtanh.f32 %v271_v38  ;;  %1196 = vmatprep.mubr.msk.f32.mxu0 %vm1761_vm0, %v1762_v27 }
  0xe5   :  { %1529 = vmatpush3.bf16.msra.mxu0 %v1528_v41  ;;  %1553 = vmatpush3.bf16.msra.mxu1 %v1528_v41 }
  0xe6   :  { %v1645_v50 = vpop.eup %1644  ;;  %1530 = vmatprep.subr.bf16.mxu0 %v1759_v1  ;;  %1554 = vmatprep.subr.bf16.mxu1 %v1759_v1 }
  0xe7   :  { %1247 = vmatmul.mubr.f32.gmra.mrb[10].mxu1 %v1645_v50 }
  0xe8   :  { %1249 = vmatprep.mubr.msk.f32.mxu1 %vm1761_vm0, %v1762_v27 }
  0xe9   :  { %1532 = vmatpush3.bf16.msra.mxu0 %v1531_v44  ;;  %1556 = vmatpush3.bf16.msra.mxu1 %v1531_v44 }
  0xea   :  { %v1647_v49 = vpop.eup %1646  ;;  %1533 = vmatprep.subr.bf16.mxu0 %v1759_v1  ;;  %1557 = vmatprep.subr.bf16.mxu1 %v1759_v1 }
  0xeb   :  { %1197 = vmatmul.mubr.f32.gmra.mrb[12].mxu0 %v1647_v49 }
  0xec   :  { %1284 = vmatprep.mubr.msk.f32.mxu0 %vm1761_vm0, %v1762_v27 }
  0xed   :  { %1535 = vmatpush3.bf16.msra.mxu0 %v1534_v47  ;;  %1559 = vmatpush3.bf16.msra.mxu1 %v1534_v47 }
  0xee   :  { %v1649_v39 = vpop.eup %1648  ;;  %1560 = vmatprep.subr.bf16.mxu0 %v1759_v1  ;;  %1584 = vmatprep.subr.bf16.mxu1 %v1759_v1 }
  0xef   :  { %1250 = vmatmul.mubr.f32.gmra.mrb[12].mxu1 %v1649_v39 }
  0xf0   :  { %1337 = vmatprep.mubr.msk.f32.mxu1 %vm1761_vm0, %v1762_v27 }
 0x191   :  { %v475_v51 = vpop.f32.mrb[0].mxu1 }
 0x192   :  { %v375_v52 = vpop.f32.mrb[0].mxu0  ;;  %v476_v53 = vadd.f32 %v2050_v48, %v475_v51  ;;  %v1233_v54 = vpop.f32.mrb[1].mxu1 }
 0x193   :  { %v376_v55 = vadd.f32 %v2050_v48, %v375_v52  ;;  %v1180_v56 = vpop.f32.mrb[1].mxu0 }
 0x194   :  { %1650 = vtanh.f32 %v476_v53 }
 0x195   :  { %1652 = vtanh.f32 %v376_v55 }
 0x196   :  { %v380_v58 = vpop.f32.mrb[2].mxu0 }
 0x197   :  { %v381_v59 = vadd.f32 %v2050_v48, %v380_v58  ;;  %v1183_v60 = vpop.f32.mrb[3].mxu0 }
 0x199   :  { %1654 = vtanh.f32 %v381_v59 }
 0x19a   :  { %v480_v61 = vpop.f32.mrb[2].mxu1 }
 0x19b   :  { %v481_v0 = vadd.f32 %v2050_v48, %v480_v61  ;;  %v1236_v2 = vpop.f32.mrb[3].mxu1 }
 0x19c   :  { %v773_v2 = vld [vmem:[#allocation4 + $0x68] sm:$0xff] }
 0x19d   :  { %1656 = vtanh.f32 %v481_v0  ;;  %v772_v0 = vld [vmem:[#allocation4 + $0x60] sm:$0xff] }
 0x19e   :  { %v1651_v4 = vpop.eup %1650  ;;  %v385_v5 = vpop.f32.mrb[4].mxu0 }
 0x19f   :  { %v1653_v8 = vpop.eup %1652  ;;  %v386_v9 = vadd.f32 %v2050_v48, %v385_v5  ;;  %v1186_v10 = vpop.f32.mrb[5].mxu0  ;;  %1338 = vmatmul.mubr.f32.vlgmr.msra.gmra.mrb[14].mxu1 %v1651_v4  ;;  %v774_v4 = vld [vmem:[#allocation4 + $0x70] sm:$0xff]  ;;  %v775_v5 = vld [vmem:[#allocation4 + $0x78] sm:$0xff] }
 0x1a0   :  { %1285 = vmatmul.mubr.f32.vlgmr.msra.gmra.mrb[14].mxu0 %v1653_v8  ;;  %1340 = vmatprep.mubr.msk.f32.mxu1 %vm1761_vm0, %v1762_v27  ;;  %v1582_v6 = vpack.c.bf16 %v775_v5, %v774_v4 }
 0x1a1   :  { %1658 = vtanh.f32 %v386_v9  ;;  %1287 = vmatprep.mubr.msk.f32.mxu0 %vm1761_vm0, %v1762_v27  ;;  %1562 = vmatpush3.bf16.msra.mxu0 %v1561_v3 }
 0x1a2   :  { %v485_v12 = vpop.f32.mrb[4].mxu1  ;;  %1586 = vmatpush3.bf16.msra.mxu1 %v1561_v3  ;;  %1563 = vmatprep.subr.bf16.mxu0 %v1759_v1  ;;  %v1579_v3 = vpack.c.bf16 %v773_v2, %v772_v0  ;;  %v1007_v0 = vld [vmem:[%s2218_s8] ss:$0 sm:$0xff] }
 0x1a3   :  { %v1655_v15 = vpop.eup %1654  ;;  %v486_v16 = vadd.f32 %v2050_v48, %v485_v12  ;;  %v1239_v17 = vpop.f32.mrb[5].mxu1  ;;  %1587 = vmatprep.subr.bf16.mxu1 %v1759_v1 }
 0x1a4   :  { %1288 = vmatmul.mubr.f32.gmra.mrb[16].mxu0 %v1655_v15 }
 0x1a5   :  { %1660 = vtanh.f32 %v486_v16  ;;  %1290 = vmatprep.mubr.msk.f32.mxu0 %vm1761_vm0, %v1762_v27  ;;  %1565 = vmatpush3.bf16.msra.mxu0 %v1564_v11 }
 0x1a6   :  { %v390_v19 = vpop.f32.mrb[6].mxu0  ;;  %1589 = vmatpush3.bf16.msra.mxu1 %v1564_v11  ;;  %1566 = vmatprep.subr.bf16.mxu0 %v1759_v1 }
 0x1a7   :  { %v1657_v22 = vpop.eup %1656  ;;  %v391_v23 = vadd.f32 %v2050_v48, %v390_v19  ;;  %v1189_v24 = vpop.f32.mrb[7].mxu0  ;;  %1590 = vmatprep.subr.bf16.mxu1 %v1759_v1 }
 0x1a8   :  { %1341 = vmatmul.mubr.f32.gmra.mrb[16].mxu1 %v1657_v22 }
 0x1a9   :  { %1662 = vtanh.f32 %v391_v23  ;;  %1343 = vmatprep.mubr.msk.f32.mxu1 %vm1761_vm0, %v1762_v27  ;;  %1568 = vmatpush3.bf16.msra.mxu0 %v1567_v18 }
 0x1aa   :  { %v490_v26 = vpop.f32.mrb[6].mxu1  ;;  %1592 = vmatpush3.bf16.msra.mxu1 %v1567_v18  ;;  %1569 = vmatprep.subr.bf16.mxu0 %v1759_v1 }
 0x1ab   :  { %v1659_v30 = vpop.eup %1658  ;;  %v491_v31 = vadd.f32 %v2050_v48, %v490_v26  ;;  %v1242_v32 = vpop.f32.mrb[7].mxu1  ;;  %1593 = vmatprep.subr.bf16.mxu1 %v1759_v1 }
 0x1ac   :  { %1291 = vmatmul.mubr.f32.gmra.mrb[18].mxu0 %v1659_v30 }
 0x1ad   :  { %1664 = vtanh.f32 %v491_v31  ;;  %1293 = vmatprep.mubr.msk.f32.mxu0 %vm1761_vm0, %v1762_v27  ;;  %1571 = vmatpush3.bf16.msra.mxu0 %v1570_v25 }
 0x1ae   :  { %v395_v34 = vpop.f32.mrb[8].mxu0  ;;  %1595 = vmatpush3.bf16.msra.mxu1 %v1570_v25  ;;  %1572 = vmatprep.subr.bf16.mxu0 %v1759_v1 }
 0x1af   :  { %v1661_v35 = vpop.eup %1660  ;;  %v396_v36 = vadd.f32 %v2050_v48, %v395_v34  ;;  %v1192_v37 = vpop.f32.mrb[9].mxu0  ;;  %1596 = vmatprep.subr.bf16.mxu1 %v1759_v1 }
 0x1b0   :  { %1344 = vmatmul.mubr.f32.gmra.mrb[18].mxu1 %v1661_v35 }
 0x1b1   :  { %1666 = vtanh.f32 %v396_v36  ;;  %1346 = vmatprep.mubr.msk.f32.mxu1 %vm1761_vm0, %v1762_v27  ;;  %1574 = vmatpush3.bf16.msra.mxu0 %v1573_v33 }
 0x1b2   :  { %v495_v38 = vpop.f32.mrb[8].mxu1  ;;  %1598 = vmatpush3.bf16.msra.mxu1 %v1573_v33  ;;  %1575 = vmatprep.subr.bf16.mxu0 %v1759_v1 }
 0x1b3   :  { %v1663_v50 = vpop.eup %1662  ;;  %v496_v49 = vadd.f32 %v2050_v48, %v495_v38  ;;  %v1245_v39 = vpop.f32.mrb[9].mxu1  ;;  %1599 = vmatprep.subr.bf16.mxu1 %v1759_v1 }
 0x1b4   :  { %1294 = vmatmul.mubr.f32.gmra.mrb[20].mxu0 %v1663_v50 }
 0x1b5   :  { %1668 = vtanh.f32 %v496_v49  ;;  %1296 = vmatprep.mubr.msk.f32.mxu0 %vm1761_vm0, %v1762_v27 }
 0x1b6   :  { %v400_v57 = vpop.f32.mrb[10].mxu0 }
 0x1b7   :  { %v1665_v40 = vpop.eup %1664  ;;  %v401_v41 = vadd.f32 %v2050_v48, %v400_v57  ;;  %v1195_v42 = vpop.f32.mrb[11].mxu0 }
 0x1b8   :  { %1347 = vmatmul.mubr.f32.gmra.mrb[20].mxu1 %v1665_v40 }
 0x1b9   :  { %1670 = vtanh.f32 %v401_v41  ;;  %1349 = vmatprep.mubr.msk.f32.mxu1 %vm1761_vm0, %v1762_v27 }
 0x1ba   :  { %v500_v43 = vpop.f32.mrb[10].mxu1 }
 0x1bb   :  { %v1667_v44 = vpop.eup %1666  ;;  %v501_v45 = vadd.f32 %v2050_v48, %v500_v43  ;;  %v1248_v46 = vpop.f32.mrb[11].mxu1 }
 0x1bc   :  { %1297 = vmatmul.mubr.f32.gmra.mrb[22].mxu0 %v1667_v44 }
 0x1bd   :  { %1672 = vtanh.f32 %v501_v45  ;;  %1299 = vmatprep.mubr.msk.f32.mxu0 %vm1761_vm0, %v1762_v27 }
 0x1be   :  { %v405_v47 = vpop.f32.mrb[12].mxu0 }
 0x1bf   :  { %v1669_v51 = vpop.eup %1668  ;;  %v406_v52 = vadd.f32 %v2050_v48, %v405_v47  ;;  %v1198_v53 = vpop.f32.mrb[13].mxu0 }
 0x1c0   :  { %1350 = vmatmul.mubr.f32.gmra.mrb[22].mxu1 %v1669_v51 }
 0x1c1   :  { %1674 = vtanh.f32 %v406_v52  ;;  %1352 = vmatprep.mubr.msk.f32.mxu1 %vm1761_vm0, %v1762_v27 }
 0x1c2   :  { %v505_v54 = vpop.f32.mrb[12].mxu1 }
 0x1c3   :  { %v1671_v55 = vpop.eup %1670  ;;  %v506_v56 = vadd.f32 %v2050_v48, %v505_v54  ;;  %v1251_v58 = vpop.f32.mrb[13].mxu1  ;;  %v770_v48 = vld [vmem:[#allocation4 + $0x50] sm:$0xff] }
 0x1c4   :  { %1300 = vmatmul.mubr.f32.gmra.mrb[24].mxu0 %v1671_v55  ;;  %v1576_v63 = vpack.c.bf16 %v771_v62, %v770_v48 }
 0x1c5   :  { %1676 = vtanh.f32 %v506_v56  ;;  %1302 = vmatprep.mubr.msk.f32.mxu0 %vm1761_vm0, %v1762_v27 }
 0x1c6   :  { %1577 = vmatpush3.bf16.msra.mxu0 %v1576_v63  ;;  %1601 = vmatpush3.bf16.msra.mxu1 %v1576_v63 }
 0x1c7   :  { %v1673_v59 = vpop.eup %1672  ;;  %1578 = vmatprep.subr.bf16.mxu0 %v1759_v1  ;;  %1602 = vmatprep.subr.bf16.mxu1 %v1759_v1 }
 0x1c8   :  { %1353 = vmatmul.mubr.f32.gmra.mrb[24].mxu1 %v1673_v59 }
 0x1c9   :  { %1355 = vmatprep.mubr.msk.f32.mxu1 %vm1761_vm0, %v1762_v27 }
 0x1ca   :  { %1580 = vmatpush3.bf16.msra.mxu0 %v1579_v3  ;;  %1604 = vmatpush3.bf16.msra.mxu1 %v1579_v3 }
 0x1cb   :  { %v1675_v60 = vpop.eup %1674  ;;  %1581 = vmatprep.subr.bf16.mxu0 %v1759_v1  ;;  %1605 = vmatprep.subr.bf16.mxu1 %v1759_v1 }
 0x1cc   :  { %1303 = vmatmul.mubr.f32.gmra.mrb[26].mxu0 %v1675_v60 }
 0x1cd   :  { %1390 = vmatprep.mubr.msk.f32.mxu0 %vm1761_vm0, %v1762_v27 }
 0x1ce   :  { %1583 = vmatpush3.bf16.msra.mxu0 %v1582_v6  ;;  %1607 = vmatpush3.bf16.msra.mxu1 %v1582_v6 }
 0x1cf   :  { %v1677_v61 = vpop.eup %1676 }
 0x1d0   :  { %1356 = vmatmul.mubr.f32.gmra.mrb[26].mxu1 %v1677_v61 }
 0x1d1   :  { %1443 = vmatprep.mubr.msk.f32.mxu1 %vm1761_vm0, %v1762_v27 }
 0x272   :  { %v712_v8 = vpop.f32.mrb[14].mxu1 }
 0x273   :  { %v612_v9 = vpop.f32.mrb[14].mxu0  ;;  %v713_v10 = vadd.f32 %v2111_v7, %v712_v8  ;;  %v1339_v11 = vpop.f32.mrb[15].mxu1 }
 0x274   :  { %v613_v12 = vadd.f32 %v2111_v7, %v612_v9  ;;  %v1286_v13 = vpop.f32.mrb[15].mxu0 }
 0x275   :  { %1678 = vtanh.f32 %v713_v10 }
 0x276   :  { %1680 = vtanh.f32 %v613_v12 }
 0x277   :  { %v617_v1 = vpop.f32.mrb[16].mxu0 }
 0x278   :  { %v618_v14 = vadd.f32 %v2111_v7, %v617_v1  ;;  %v1289_v15 = vpop.f32.mrb[17].mxu0 }
 0x27a   :  { %1682 = vtanh.f32 %v618_v14 }
 0x27b   :  { %v717_v16 = vpop.f32.mrb[16].mxu1 }
 0x27c   :  { %v718_v17 = vadd.f32 %v2111_v7, %v717_v16  ;;  %v1342_v18 = vpop.f32.mrb[17].mxu1 }
 0x27e   :  { %1684 = vtanh.f32 %v718_v17 }
 0x27f   :  { %v1679_v19 = vpop.eup %1678  ;;  %v622_v20 = vpop.f32.mrb[18].mxu0 }
 0x280   :  { %v1681_v21 = vpop.eup %1680  ;;  %v623_v22 = vadd.f32 %v2111_v7, %v622_v20  ;;  %v1292_v23 = vpop.f32.mrb[19].mxu0  ;;  %1444 = vmatmul.mubr.f32.vlgmr.msra.gmra.mrb[28].mxu1 %v1679_v19 }
 0x281   :  { %1391 = vmatmul.mubr.f32.vlgmr.msra.gmra.mrb[28].mxu0 %v1681_v21  ;;  %1446 = vmatprep.mubr.msk.f32.mxu1 %vm1761_vm0, %v1762_v27 }
 0x282   :  { %1686 = vtanh.f32 %v623_v22  ;;  %1393 = vmatprep.mubr.msk.f32.mxu0 %vm1761_vm0, %v1762_v27 }
 0x283   :  { %v722_v24 = vpop.f32.mrb[18].mxu1 }
 0x284   :  { %v1683_v25 = vpop.eup %1682  ;;  %v723_v26 = vadd.f32 %v2111_v7, %v722_v24  ;;  %v1345_v28 = vpop.f32.mrb[19].mxu1 }
 0x285   :  { %1394 = vmatmul.mubr.f32.gmra.mrb[30].mxu0 %v1683_v25 }
 0x286   :  { %1688 = vtanh.f32 %v723_v26  ;;  %1396 = vmatprep.mubr.msk.f32.mxu0 %vm1761_vm0, %v1762_v27 }
 0x287   :  { %v627_v29 = vpop.f32.mrb[20].mxu0 }
 0x288   :  { %v1685_v30 = vpop.eup %1684  ;;  %v628_v31 = vadd.f32 %v2111_v7, %v627_v29  ;;  %v1295_v32 = vpop.f32.mrb[21].mxu0 }
 0x289   :  { %1447 = vmatmul.mubr.f32.gmra.mrb[30].mxu1 %v1685_v30 }
 0x28a   :  { %1690 = vtanh.f32 %v628_v31  ;;  %1449 = vmatprep.mubr.msk.f32.mxu1 %vm1761_vm0, %v1762_v27 }
 0x28b   :  { %v727_v33 = vpop.f32.mrb[20].mxu1 }
 0x28c   :  { %v1687_v34 = vpop.eup %1686  ;;  %v728_v35 = vadd.f32 %v2111_v7, %v727_v33  ;;  %v1348_v36 = vpop.f32.mrb[21].mxu1 }
 0x28d   :  { %1397 = vmatmul.mubr.f32.gmra.mrb[32].mxu0 %v1687_v34 }
 0x28e   :  { %1692 = vtanh.f32 %v728_v35  ;;  %1399 = vmatprep.mubr.msk.f32.mxu0 %vm1761_vm0, %v1762_v27 }
 0x28f   :  { %v632_v37 = vpop.f32.mrb[22].mxu0 }
 0x290   :  { %v1689_v38 = vpop.eup %1688  ;;  %v633_v50 = vadd.f32 %v2111_v7, %v632_v37  ;;  %v1298_v49 = vpop.f32.mrb[23].mxu0 }
 0x291   :  { %1450 = vmatmul.mubr.f32.gmra.mrb[32].mxu1 %v1689_v38 }
 0x292   :  { %1694 = vtanh.f32 %v633_v50  ;;  %1452 = vmatprep.mubr.msk.f32.mxu1 %vm1761_vm0, %v1762_v27 }
 0x293   :  { %v732_v39 = vpop.f32.mrb[22].mxu1 }
 0x294   :  { %v1691_v57 = vpop.eup %1690  ;;  %v733_v40 = vadd.f32 %v2111_v7, %v732_v39  ;;  %v1351_v41 = vpop.f32.mrb[23].mxu1 }
 0x295   :  { %1400 = vmatmul.mubr.f32.gmra.mrb[34].mxu0 %v1691_v57 }
 0x296   :  { %1696 = vtanh.f32 %v733_v40  ;;  %1402 = vmatprep.mubr.msk.f32.mxu0 %vm1761_vm0, %v1762_v27 }
 0x297   :  { %v637_v42 = vpop.f32.mrb[24].mxu0 }
 0x298   :  { %v1693_v43 = vpop.eup %1692  ;;  %v638_v44 = vadd.f32 %v2111_v7, %v637_v42  ;;  %v1301_v45 = vpop.f32.mrb[25].mxu0 }
 0x299   :  { %1453 = vmatmul.mubr.f32.gmra.mrb[34].mxu1 %v1693_v43 }
 0x29a   :  { %1698 = vtanh.f32 %v638_v44  ;;  %1455 = vmatprep.mubr.msk.f32.mxu1 %vm1761_vm0, %v1762_v27 }
 0x29b   :  { %v737_v46 = vpop.f32.mrb[24].mxu1 }
 0x29c   :  { %v1695_v47 = vpop.eup %1694  ;;  %v738_v51 = vadd.f32 %v2111_v7, %v737_v46  ;;  %v1354_v52 = vpop.f32.mrb[25].mxu1 }
 0x29d   :  { %1403 = vmatmul.mubr.f32.gmra.mrb[36].mxu0 %v1695_v47 }
 0x29e   :  { %1700 = vtanh.f32 %v738_v51  ;;  %1405 = vmatprep.mubr.msk.f32.mxu0 %vm1761_vm0, %v1762_v27 }
 0x29f   :  { %v642_v53 = vpop.f32.mrb[26].mxu0 }
 0x2a0   :  { %v1697_v54 = vpop.eup %1696  ;;  %v643_v55 = vadd.f32 %v2111_v7, %v642_v53  ;;  %v1304_v56 = vpop.f32.mrb[27].mxu0 }
 0x2a1   :  { %1456 = vmatmul.mubr.f32.gmra.mrb[36].mxu1 %v1697_v54 }
 0x2a2   :  { %1702 = vtanh.f32 %v643_v55  ;;  %1458 = vmatprep.mubr.msk.f32.mxu1 %vm1761_vm0, %v1762_v27 }
 0x2a3   :  { %v742_v58 = vpop.f32.mrb[26].mxu1 }
 0x2a4   :  { %v1699_v59 = vpop.eup %1698  ;;  %v743_v60 = vadd.f32 %v2111_v7, %v742_v58  ;;  %v1357_v61 = vpop.f32.mrb[27].mxu1 }
 0x2a5   :  { %1406 = vmatmul.mubr.f32.gmra.mrb[38].mxu0 %v1699_v59 }
 0x2a6   :  { %1704 = vtanh.f32 %v743_v60  ;;  %1408 = vmatprep.mubr.msk.f32.mxu0 %vm1761_vm0, %v1762_v27 }
 0x2a8   :  { %v1701_v48 = vpop.eup %1700 }
 0x2a9   :  { %1459 = vmatmul.mubr.f32.gmra.mrb[38].mxu1 %v1701_v48 }
 0x2aa   :  { %1461 = vmatprep.mubr.msk.f32.mxu1 %vm1761_vm0, %v1762_v27 }
 0x2ac   :  { %v1703_v62 = vpop.eup %1702 }
 0x2ad   :  { %1409 = vmatmul.mubr.f32.gmra.mrb[40].mxu0 %v1703_v62 }
 0x2b0   :  { %v1705_v63 = vpop.eup %1704 }
 0x2b1   :  { %1462 = vmatmul.mubr.f32.gmra.mrb[40].mxu1 %v1705_v63 }
 0x353   :  { %v949_v2 = vpop.f32.mrb[28].mxu1 }
 0x354   :  { %v849_v3 = vpop.f32.mrb[28].mxu0  ;;  %v950_v4 = vadd.f32 %v1007_v0, %v949_v2  ;;  %v1445_v5 = vpop.f32.mrb[29].mxu1 }
 0x355   :  { %v850_v6 = vadd.f32 %v1007_v0, %v849_v3  ;;  %v1392_v7 = vpop.f32.mrb[29].mxu0 }
 0x356   :  { %991 = vst.msk [vmem:[%s2219_s9 + $0x38] sm:$0xff] %vm983_vm1, %v950_v4 }
 0x357   :  { %984 = vst.msk [vmem:[%s2219_s9] sm:$0xff] %vm983_vm1, %v850_v6 }
 0x358   :  { %v854_v27 = vpop.f32.mrb[30].mxu0 }
 0x359   :  { %v855_v8 = vadd.f32 %v1007_v0, %v854_v27  ;;  %v1395_v9 = vpop.f32.mrb[31].mxu0 }
 0x35b   :  { %985 = vst.msk [vmem:[%s2219_s9 + $0x8] sm:$0xff] %vm983_vm1, %v855_v8 }
 0x35c   :  { %v954_v10 = vpop.f32.mrb[30].mxu1 }
 0x35d   :  { %v955_v11 = vadd.f32 %v1007_v0, %v954_v10  ;;  %v1448_v12 = vpop.f32.mrb[31].mxu1 }
 0x35f   :  { %992 = vst.msk [vmem:[%s2219_s9 + $0x40] sm:$0xff] %vm983_vm1, %v955_v11 }
 0x360   :  { %v859_v13 = vpop.f32.mrb[32].mxu0 }
 0x361   :  { %v860_v1 = vadd.f32 %v1007_v0, %v859_v13  ;;  %v1398_v14 = vpop.f32.mrb[33].mxu0 }
 0x363   :  { %986 = vst.msk [vmem:[%s2219_s9 + $0x10] sm:$0xff] %vm983_vm1, %v860_v1 }
 0x364   :  { %v959_v15 = vpop.f32.mrb[32].mxu1 }
 0x365   :  { %v960_v16 = vadd.f32 %v1007_v0, %v959_v15  ;;  %v1451_v17 = vpop.f32.mrb[33].mxu1 }
 0x367   :  { %993 = vst.msk [vmem:[%s2219_s9 + $0x48] sm:$0xff] %vm983_vm1, %v960_v16 }
 0x368   :  { %v864_v18 = vpop.f32.mrb[34].mxu0 }
 0x369   :  { %v865_v19 = vadd.f32 %v1007_v0, %v864_v18  ;;  %v1401_v20 = vpop.f32.mrb[35].mxu0 }
 0x36b   :  { %987 = vst.msk [vmem:[%s2219_s9 + $0x18] sm:$0xff] %vm983_vm1, %v865_v19 }
 0x36c   :  { %v964_v21 = vpop.f32.mrb[34].mxu1 }
 0x36d   :  { %v965_v22 = vadd.f32 %v1007_v0, %v964_v21  ;;  %v1454_v23 = vpop.f32.mrb[35].mxu1 }
 0x36f   :  { %994 = vst.msk [vmem:[%s2219_s9 + $0x50] sm:$0xff] %vm983_vm1, %v965_v22 }
 0x370   :  { %v869_v24 = vpop.f32.mrb[36].mxu0 }
 0x371   :  { %v870_v25 = vadd.f32 %v1007_v0, %v869_v24  ;;  %v1404_v26 = vpop.f32.mrb[37].mxu0 }
 0x373   :  { %988 = vst.msk [vmem:[%s2219_s9 + $0x20] sm:$0xff] %vm983_vm1, %v870_v25 }
 0x374   :  { %v969_v28 = vpop.f32.mrb[36].mxu1 }
 0x375   :  { %v970_v29 = vadd.f32 %v1007_v0, %v969_v28  ;;  %v1457_v30 = vpop.f32.mrb[37].mxu1 }
 0x377   :  { %995 = vst.msk [vmem:[%s2219_s9 + $0x58] sm:$0xff] %vm983_vm1, %v970_v29 }
 0x378   :  { %v874_v31 = vpop.f32.mrb[38].mxu0 }
 0x379   :  { %v875_v32 = vadd.f32 %v1007_v0, %v874_v31  ;;  %v1407_v33 = vpop.f32.mrb[39].mxu0 }
 0x37b   :  { %989 = vst.msk [vmem:[%s2219_s9 + $0x28] sm:$0xff] %vm983_vm1, %v875_v32 }
 0x37c   :  { %v974_v34 = vpop.f32.mrb[38].mxu1 }
 0x37d   :  { %v975_v35 = vadd.f32 %v1007_v0, %v974_v34  ;;  %v1460_v36 = vpop.f32.mrb[39].mxu1 }
 0x37f   :  { %996 = vst.msk [vmem:[%s2219_s9 + $0x60] sm:$0xff] %vm983_vm1, %v975_v35 }
 0x380   :  { %v879_v37 = vpop.f32.mrb[40].mxu0 }
 0x381   :  { %v880_v38 = vadd.f32 %v1007_v0, %v879_v37  ;;  %v1410_v50 = vpop.f32.mrb[41].mxu0 }
 0x383   :  { %990 = vst.msk [vmem:[%s2219_s9 + $0x30] sm:$0xff] %vm983_vm1, %v880_v38 }
 0x384   :  { %v979_v49 = vpop.f32.mrb[40].mxu1 }
 0x385   :  { %v980_v39 = vadd.f32 %v1007_v0, %v979_v49  ;;  %v1463_v57 = vpop.f32.mrb[41].mxu1 }
 0x387   :  { %997 = vst.msk [vmem:[%s2219_s9 + $0x68] sm:$0xff] %vm983_vm1, %v980_v39 }
 0x388   :  { %1002 = vsyncpa [#allocation3], 1 }
 0x389   :  { %1003 = vsyncpa [#allocation5], 1 }

</bundles_post_ra>
